<compile_context>
chip_gen: v5e
topology: v5e:2x2
jax: 0.10.0
libtpu: 0.0.40
codegen_flags: <defaults>
</compile_context>

<pallas_src>
import jax
import jax.numpy as jnp
from jax.experimental import pallas as pl
from jax.experimental.pallas import tpu as pltpu


def agent_kernel(x_ref, w1_ref, b1_ref, w2_ref, b2_ref, w3_ref, b3_ref, out_ref):
    """Fused 3x(Linear+ReLU) + softmax, batch-on-lanes layout.

    x_ref  : (dim_in,  TILE_B)  features on sublanes, batch on lanes
    w*_ref : (fan_out, fan_in)  PyTorch nn.Linear weight layout (no transpose)
    b*_ref : (fan_out, 1)
    out_ref: (dim_out, TILE_B)
    """
    x = x_ref[...]

    # layer_1 + layer_2
    h = jnp.dot(w1_ref[...], x, preferred_element_type=jnp.float32) + b1_ref[...]
    h = jnp.maximum(h, 0.0)

    # layer_3 + layer_4
    h = jnp.dot(w2_ref[...], h, preferred_element_type=jnp.float32) + b2_ref[...]
    h = jnp.maximum(h, 0.0)

    # layer_5 + layer_6
    h = jnp.dot(w3_ref[...], h, preferred_element_type=jnp.float32) + b3_ref[...]
    h = jnp.maximum(h, 0.0)

    # layer_7: softmax over features (axis 0 = a couple of sublanes), per batch
    # column.  Exact normalization so probabilities sum to 1 like nn.Softmax.
    m = jnp.max(h, axis=0, keepdims=True)
    e = jnp.exp(h - m)
    s = jnp.sum(e, axis=0, keepdims=True)
    out_ref[...] = (e / s).astype(out_ref.dtype)


def _round_up(n, m):
    return ((n + m - 1) // m) * m


# Cap per-tile VMEM (activations are ~ dim_calc * tile * 4 B each); 8192 lanes
# keeps everything well under v5e's 16 MiB default scoped VMEM.
_MAX_TILE = 8192
# Up to this many (padded) batch rows we use a single grid step (grid steps are
# a sequential loop costing ~0.35us each -- pure overhead for a model this small).
_SINGLE_STEP_MAX = 1024


def _choose_tiling(batch):
    padded = _round_up(batch, 128)
    if padded <= _SINGLE_STEP_MAX:
        return padded, padded            # one grid step
    # >= 2 tiles so v7x can use both TensorCores; tile stays a multiple of 128.
    tile = min(_round_up((padded + 1) // 2, 128), _MAX_TILE)
    padded = _round_up(batch, tile)
    return padded, tile


@jax.jit
def agent_forward(x, w1, b1, w2, b2, w3, b3):
    batch, dim_in = x.shape
    dim_calc = w1.shape[0]
    dim_out = w3.shape[0]

    padded, tile = _choose_tiling(batch)
    grid = (padded // tile,)

    # Single wrapper-side layout op: transpose to (dim_in, batch) and pad the
    # lane (batch) axis.  Padded columns are zeros -> bias-only logits -> valid
    # softmax values that are sliced off below (no NaNs, no contamination).
    x_t = jnp.transpose(x)
    if padded != batch:
        x_t = jnp.pad(x_t, ((0, 0), (0, padded - batch)))

    flops = 2 * batch * (dim_in * dim_calc + dim_calc * dim_calc + dim_calc * dim_out)
    bytes_accessed = 4 * (batch * dim_in + batch * dim_out
                          + dim_in * dim_calc + dim_calc * dim_calc
                          + dim_calc * dim_out + 2 * dim_calc + dim_out)
    cost = pl.CostEstimate(flops=flops,
                           transcendentals=batch * dim_out,
                           bytes_accessed=bytes_accessed)

    out_t = pl.pallas_call(
        agent_kernel,
        out_shape=jax.ShapeDtypeStruct((dim_out, padded), jnp.float32),
        grid=grid,
        in_specs=[
            pl.BlockSpec((dim_in, tile), lambda i: (0, i)),   # x: tiled over batch lanes
            pl.BlockSpec(w1.shape, lambda i: (0, 0)),         # weights/biases resident
            pl.BlockSpec(b1.shape, lambda i: (0, 0)),
            pl.BlockSpec(w2.shape, lambda i: (0, 0)),
            pl.BlockSpec(b2.shape, lambda i: (0, 0)),
            pl.BlockSpec(w3.shape, lambda i: (0, 0)),
            pl.BlockSpec(b3.shape, lambda i: (0, 0)),
        ],
        out_specs=pl.BlockSpec((dim_out, tile), lambda i: (0, i)),
        compiler_params=pltpu.CompilerParams(
            dimension_semantics=("parallel",),   # batch tiles independent (v7x dual-TC)
        ),
        cost_estimate=cost,
    )(x_t, w1, b1, w2, b2, w3, b3)

    # Back to the PyTorch layout (batch, dim_out); drop padded columns.
    return jnp.transpose(out_t[:, :batch])


def init_linear(key, fan_in, fan_out):
    """PyTorch nn.Linear default init: U(-1/sqrt(fan_in), 1/sqrt(fan_in)).

    Weight kept in PyTorch layout (fan_out, fan_in); bias as (fan_out, 1) so it
    broadcasts along the lane (batch) axis inside the kernel.
    """
    kw, kb = jax.random.split(key)
    bound = 1.0 / jnp.sqrt(jnp.float32(fan_in))
    w = jax.random.uniform(kw, (fan_out, fan_in), jnp.float32, -bound, bound)
    b = jax.random.uniform(kb, (fan_out, 1), jnp.float32, -bound, bound)
    return w, b


if __name__ == "__main__":
    # CartPole-like sizes: observation dim 4, hidden 32, action dim 2.
    batch, dim_in, dim_calc, dim_out = 2, 4, 32, 2

    root = jax.random.PRNGKey(0)
    k_x, k1, k2, k3 = jax.random.split(root, 4)

    x = jax.random.normal(k_x, (batch, dim_in), jnp.float32)
    w1, b1 = init_linear(k1, dim_in, dim_calc)
    w2, b2 = init_linear(k2, dim_calc, dim_calc)
    w3, b3 = init_linear(k3, dim_calc, dim_out)

    # Pure-f32 reference matching the PyTorch module (x @ W.T + b per layer).
    hp = jax.lax.Precision.HIGHEST

    def ref(xin):
        h = jnp.maximum(jnp.dot(xin, w1.T, precision=hp) + b1.T, 0.0)
        h = jnp.maximum(jnp.dot(h, w2.T, precision=hp) + b2.T, 0.0)
        h = jnp.maximum(jnp.dot(h, w3.T, precision=hp) + b3.T, 0.0)
        return jax.nn.softmax(h, axis=1)

    # Small-batch run (spec-sized): 1 grid step, lane-padded to 128.
    out = jax.block_until_ready(agent_forward(x, w1, b1, w2, b2, w3, b3))
    assert out.shape == (batch, dim_out)
    assert jnp.allclose(out, ref(x), atol=2e-3, rtol=2e-3)

    # Larger batches: padded-tail path (200 -> one 256-lane tile) and the
    # multi-tile path (3000 -> two 1536-lane tiles, exercises v7x dual-TC sharding).
    for big_batch in (200, 3000):
        xb = jax.random.normal(jax.random.PRNGKey(1), (big_batch, dim_in), jnp.float32)
        ob = jax.block_until_ready(agent_forward(xb, w1, b1, w2, b2, w3, b3))
        assert ob.shape == (big_batch, dim_out)
        assert jnp.allclose(ob, ref(xb), atol=2e-3, rtol=2e-3)

    print("KERNEL_OK")
</pallas_src>

<mosaic_0001>
module attributes {stable_mosaic.version = 11 : i64} {
  func.func @agent_kernel(%arg0: i32, %arg1: memref<4x128xf32, #tpu.memory_space<vmem>>, %arg2: memref<32x4xf32, #tpu.memory_space<vmem>>, %arg3: memref<32x1xf32, #tpu.memory_space<vmem>>, %arg4: memref<32x32xf32, #tpu.memory_space<vmem>>, %arg5: memref<32x1xf32, #tpu.memory_space<vmem>>, %arg6: memref<2x32xf32, #tpu.memory_space<vmem>>, %arg7: memref<2x1xf32, #tpu.memory_space<vmem>>, %arg8: memref<2x128xf32, #tpu.memory_space<vmem>>) attributes {dimension_semantics = [#tpu.dimension_semantics<parallel>], iteration_bounds = array<i64: 1>, scalar_prefetch = 0 : i64, scratch_operands = 0 : i64, tpu.core_type = #tpu.core_type<tc>, window_params = [{transform_indices = @transform_0, window_bounds = array<i64: 4, 128>}, {pipeline_mode = #tpu.pipeline_mode<synchronous>, transform_indices = @transform_1, window_bounds = array<i64: 32, 4>}, {pipeline_mode = #tpu.pipeline_mode<synchronous>, transform_indices = @transform_2, window_bounds = array<i64: 32, 1>}, {pipeline_mode = #tpu.pipeline_mode<synchronous>, transform_indices = @transform_3, window_bounds = array<i64: 32, 32>}, {pipeline_mode = #tpu.pipeline_mode<synchronous>, transform_indices = @transform_4, window_bounds = array<i64: 32, 1>}, {pipeline_mode = #tpu.pipeline_mode<synchronous>, transform_indices = @transform_5, window_bounds = array<i64: 2, 32>}, {pipeline_mode = #tpu.pipeline_mode<synchronous>, transform_indices = @transform_6, window_bounds = array<i64: 2, 1>}, {transform_indices = @transform_7, window_bounds = array<i64: 2, 128>}]} {
    %c0 = arith.constant 0 : index
    %c0_0 = arith.constant 0 : index
    %0 = vector.load %arg1[%c0, %c0_0] : memref<4x128xf32, #tpu.memory_space<vmem>>, vector<4x128xf32>
    %c0_1 = arith.constant 0 : index
    %c0_2 = arith.constant 0 : index
    %1 = vector.load %arg2[%c0_1, %c0_2] : memref<32x4xf32, #tpu.memory_space<vmem>>, vector<32x4xf32>
    %cst = arith.constant dense<0.000000e+00> : vector<32x128xf32>
    %2 = tpu.matmul %1, %0, %cst {dimension_numbers = #tpu.dot_dimension_numbers<[1], [0], [0], [1], [0, 0, 1, 1], [], []>} : vector<32x4xf32>, vector<4x128xf32>, vector<32x128xf32> -> vector<32x128xf32>
    %c0_3 = arith.constant 0 : index
    %c0_4 = arith.constant 0 : index
    %3 = vector.load %arg3[%c0_3, %c0_4] : memref<32x1xf32, #tpu.memory_space<vmem>>, vector<32x1xf32>
    %4 = vector.broadcast %3 : vector<32x1xf32> to vector<32x128xf32>
    %5 = arith.addf %2, %4 : vector<32x128xf32>
    %cst_5 = arith.constant 0.000000e+00 : f32
    %6 = vector.broadcast %cst_5 : f32 to vector<32x128xf32>
    %7 = arith.maximumf %5, %6 : vector<32x128xf32>
    %c0_6 = arith.constant 0 : index
    %c0_7 = arith.constant 0 : index
    %8 = vector.load %arg4[%c0_6, %c0_7] : memref<32x32xf32, #tpu.memory_space<vmem>>, vector<32x32xf32>
    %cst_8 = arith.constant dense<0.000000e+00> : vector<32x128xf32>
    %9 = tpu.matmul %8, %7, %cst_8 {dimension_numbers = #tpu.dot_dimension_numbers<[1], [0], [0], [1], [0, 0, 1, 1], [], []>} : vector<32x32xf32>, vector<32x128xf32>, vector<32x128xf32> -> vector<32x128xf32>
    %c0_9 = arith.constant 0 : index
    %c0_10 = arith.constant 0 : index
    %10 = vector.load %arg5[%c0_9, %c0_10] : memref<32x1xf32, #tpu.memory_space<vmem>>, vector<32x1xf32>
    %11 = vector.broadcast %10 : vector<32x1xf32> to vector<32x128xf32>
    %12 = arith.addf %9, %11 : vector<32x128xf32>
    %cst_11 = arith.constant 0.000000e+00 : f32
    %13 = vector.broadcast %cst_11 : f32 to vector<32x128xf32>
    %14 = arith.maximumf %12, %13 : vector<32x128xf32>
    %c0_12 = arith.constant 0 : index
    %c0_13 = arith.constant 0 : index
    %15 = vector.load %arg6[%c0_12, %c0_13] : memref<2x32xf32, #tpu.memory_space<vmem>>, vector<2x32xf32>
    %cst_14 = arith.constant dense<0.000000e+00> : vector<2x128xf32>
    %16 = tpu.matmul %15, %14, %cst_14 {dimension_numbers = #tpu.dot_dimension_numbers<[1], [0], [0], [1], [0, 0, 1, 1], [], []>} : vector<2x32xf32>, vector<32x128xf32>, vector<2x128xf32> -> vector<2x128xf32>
    %c0_15 = arith.constant 0 : index
    %c0_16 = arith.constant 0 : index
    %17 = vector.load %arg7[%c0_15, %c0_16] : memref<2x1xf32, #tpu.memory_space<vmem>>, vector<2x1xf32>
    %18 = vector.broadcast %17 : vector<2x1xf32> to vector<2x128xf32>
    %19 = arith.addf %16, %18 : vector<2x128xf32>
    %cst_17 = arith.constant 0.000000e+00 : f32
    %20 = vector.broadcast %cst_17 : f32 to vector<2x128xf32>
    %21 = arith.maximumf %19, %20 : vector<2x128xf32>
    %cst_18 = arith.constant dense<0xFF800000> : vector<128xf32>
    %22 = vector.multi_reduction <maximumf>, %21, %cst_18 [0] : vector<2x128xf32> to vector<128xf32>
    %23 = vector.shape_cast %22 : vector<128xf32> to vector<1x128xf32>
    %24 = vector.broadcast %23 : vector<1x128xf32> to vector<2x128xf32>
    %25 = arith.subf %21, %24 : vector<2x128xf32>
    %26 = math.exp %25 : vector<2x128xf32>
    %cst_19 = arith.constant dense<0.000000e+00> : vector<128xf32>
    %27 = vector.multi_reduction <add>, %26, %cst_19 [0] : vector<2x128xf32> to vector<128xf32>
    %28 = vector.shape_cast %27 : vector<128xf32> to vector<1x128xf32>
    %29 = vector.broadcast %28 : vector<1x128xf32> to vector<2x128xf32>
    %30 = arith.divf %26, %29 : vector<2x128xf32>
    %c0_20 = arith.constant 0 : index
    %c0_21 = arith.constant 0 : index
    %31 = vector.load %arg8[%c0_20, %c0_21] : memref<2x128xf32, #tpu.memory_space<vmem>>, vector<2x128xf32>
    tpu.vector_store %arg8[%c0_20, %c0_21], %30 {strides = array<i32>} : memref<2x128xf32, #tpu.memory_space<vmem>>, vector<2x128xf32>,
    return
  }
  func.func @transform_0(%arg0: i32) -> (i32, i32) {
    %c0_i32 = arith.constant 0 : i32
    %c0_i32_0 = arith.constant 0 : i32
    return %c0_i32, %arg0 : i32, i32
  }
  func.func @transform_1(%arg0: i32) -> (i32, i32) {
    %c0_i32 = arith.constant 0 : i32
    %c0_i32_0 = arith.constant 0 : i32
    %c0_i32_1 = arith.constant 0 : i32
    return %c0_i32, %c0_i32_0 : i32, i32
  }
  func.func @transform_2(%arg0: i32) -> (i32, i32) {
    %c0_i32 = arith.constant 0 : i32
    %c0_i32_0 = arith.constant 0 : i32
    %c0_i32_1 = arith.constant 0 : i32
    return %c0_i32, %c0_i32_0 : i32, i32
  }
  func.func @transform_3(%arg0: i32) -> (i32, i32) {
    %c0_i32 = arith.constant 0 : i32
    %c0_i32_0 = arith.constant 0 : i32
    %c0_i32_1 = arith.constant 0 : i32
    return %c0_i32, %c0_i32_0 : i32, i32
  }
  func.func @transform_4(%arg0: i32) -> (i32, i32) {
    %c0_i32 = arith.constant 0 : i32
    %c0_i32_0 = arith.constant 0 : i32
    %c0_i32_1 = arith.constant 0 : i32
    return %c0_i32, %c0_i32_0 : i32, i32
  }
  func.func @transform_5(%arg0: i32) -> (i32, i32) {
    %c0_i32 = arith.constant 0 : i32
    %c0_i32_0 = arith.constant 0 : i32
    %c0_i32_1 = arith.constant 0 : i32
    return %c0_i32, %c0_i32_0 : i32, i32
  }
  func.func @transform_6(%arg0: i32) -> (i32, i32) {
    %c0_i32 = arith.constant 0 : i32
    %c0_i32_0 = arith.constant 0 : i32
    %c0_i32_1 = arith.constant 0 : i32
    return %c0_i32, %c0_i32_0 : i32, i32
  }
  func.func @transform_7(%arg0: i32) -> (i32, i32) {
    %c0_i32 = arith.constant 0 : i32
    %c0_i32_0 = arith.constant 0 : i32
    return %c0_i32, %arg0 : i32, i32
  }
}

</mosaic_0001>

<bundles_post_ra>
// kernel: agent_forward.1
= control target key start
LH: loop header
LB: loop body
LE: loop exit
PB: predicated region body
PF: predicated region fallthrough
CT: control target
= control target key end

     0   :  { %vm68_vm0 = vcmask 1043456   ;;  %vm55_vm1 = vcmask 31744   ;;  %v271_v2 = vmov 0   ;;  %vm133_vm2 = vcmask 261120   ;;  %s381_s0 = inlined_call_operand.vmem [shape: f32[4,128], index: 0, kind: input, shape index: {}]   ;;  %s382_s1 = inlined_call_operand.vmem [shape: f32[32,4], index: 1, kind: input, shape index: {}]   ;;  %s383_s2 = inlined_call_operand.vmem [shape: f32[32,1], index: 2, kind: input, shape index: {}]   ;;  %s384_s4 = inlined_call_operand.vmem [shape: f32[32,1], index: 4, kind: input, shape index: {}]   ;;  %s385_s6 = inlined_call_operand.vmem [shape: f32[2,1], index: 6, kind: input, shape index: {}]   ;;  %s386_s3 = inlined_call_operand.vmem [shape: f32[32,32], index: 3, kind: input, shape index: {}]   ;;  %s387_s5 = inlined_call_operand.vmem [shape: f32[2,32], index: 5, kind: input, shape index: {}]   ;;  %s388_s7 = inlined_call_operand.vmem [shape: f32[2,128], index: 7, kind: output, shape index: {}]  }
   0x1   :  { %v26_v0 = vld [vmem:[%s381_s0] sm:$0xf]  ;;  %265 = vset.pattern.permute.xlu1 %v271_v2  ;;  %264 = vset.pattern.permute.xlu0 %v271_v2  ;;  %v30_v3 = vld [vmem:[%s382_s1 + $0x18] sm:$0xff]  ;;  %v32_v5 = vld [vmem:[%s383_s2 + $0x8] sm:$0xff]  ;;  %vm210_vm3 = vcmask 1041408  }
   0x2   :  { %v27_v1 = vld [vmem:[%s382_s1] sm:$0xff]  ;;  %248 = vmatpush.msk.msra.mxu0 %vm68_vm0, %v26_v0  ;;  %258 = vmatpush.msk.msra.mxu2 %vm68_vm0, %v26_v0  ;;  %v34_v4 = vld [vmem:[%s383_s2 + $0x18] sm:$0xff]  ;;  %v28_v6 = vld [vmem:[%s382_s1 + $0x8] sm:$0xff] }
   0x3   :  { %249 = vmatmul.msk.f32.vlgmr.msra.gmra.mxu0 %vm55_vm1, %v27_v1  ;;  %252 = vmatmul.msk.f32.vlgmr.msra.gmra.mxu2 %vm55_vm1, %v30_v3  ;;  %v33_v7 = vld [vmem:[%s383_s2 + $0x10] sm:$0xff]  ;;  %v31_v8 = vld [vmem:[%s383_s2] sm:$0xff]  ;;  %v110_v10 = vld [vmem:[%s384_s4 + $0x8] sm:$0xff] }
   0x4   :  { %52 = vperm.xlu0 %264, %v34_v4   ;;  %42 = vperm.xlu1 %265, %v32_v5   ;;  %v29_v9 = vld [vmem:[%s382_s1 + $0x10] sm:$0xff]  ;;  %v109_v11 = vld [vmem:[%s384_s4] sm:$0xff]  ;;  %v112_v13 = vld [vmem:[%s384_s4 + $0x18] sm:$0xff] }
   0x5   :  { %266 = vset.pattern.permute.xlu2 %v271_v2  ;;  %v111_v20 = vld [vmem:[%s384_s4 + $0x10] sm:$0xff]  ;;  %v180_v26 = vld [vmem:[%s385_s6] sm:$0x3]  ;;  %v106_v33 = vld [vmem:[%s386_s3 + $0x8] sm:$0xff] }
   0x6   :  { %130 = vperm.xlu2 %266, %v112_v13   ;;  %v105_v31 = vld [vmem:[%s386_s3] sm:$0xff]  ;;  %v107_v32 = vld [vmem:[%s386_s3 + $0x10] sm:$0xff]  ;;  %v108_v34 = vld [vmem:[%s386_s3 + $0x18] sm:$0xff] }
   0x7   :  { %v179_v51 = vld [vmem:[%s387_s5] sm:$0x3] }
   0xb   :  { %250 = vmatmul.msk.f32.gmra.mxu0 %vm55_vm1, %v28_v6 }
   0xc   :  { %47 = vperm.xlu0 %264, %v33_v7   ;;  %37 = vperm.xlu1 %265, %v31_v8  }
   0xe   :  { %125 = vperm.xlu2 %266, %v111_v20  }
  0x13   :  { %251 = vmatmul.msk.f32.gmra.mxu0 %vm55_vm1, %v29_v9 }
  0x14   :  { %120 = vperm.xlu0 %264, %v110_v10   ;;  %115 = vperm.xlu1 %265, %v109_v11  }
  0x16   :  { %183 = vperm.xlu2 %266, %v180_v26  }
  0x60   :  { %v131_v35 = vpop.permute.xlu2 %130 }
  0x68   :  { %v126_v38 = vpop.permute.xlu2 %125 }
  0x70   :  { %v184_v52 = vpop.permute.xlu2 %183 }
  0x76   :  { %v53_v14 = vpop.permute.xlu0 %52  ;;  %v43_v15 = vpop.permute.xlu1 %42 }
  0x7e   :  { %v48_v21 = vpop.permute.xlu0 %47  ;;  %v38_v22 = vpop.permute.xlu1 %37 }
  0x80   :  { %v89_v12 = vpop.f32.mrf.mxu0 }
  0x81   :  { %v90_v27 = vadd.f32 %v89_v12, %v38_v22 }
  0x83   :  { %v101_v30 = vmax.f32 %v90_v27, 0.0 }
  0x86   :  { %v98_v16 = vpop.f32.mrf.mxu2  ;;  %v121_v43 = vpop.permute.xlu0 %120 }
  0x87   :  { %v99_v17 = vadd.f32 %v98_v16, %v53_v14  ;;  %v116_v46 = vpop.permute.xlu1 %115 }
  0x88   :  { %v92_v18 = vpop.f32.mrf.mxu0 }
  0x89   :  { %v104_v19 = vmax.f32 %v99_v17, 0.0  ;;  %v93_v24 = vadd.f32 %v92_v18, %v43_v15 }
  0x8b   :  { %158 = vmatpush.msra.mxu1 %v104_v19  ;;  %259 = vmatpush.msra.mxu3 %v104_v19  ;;  %v102_v29 = vmax.f32 %v93_v24, 0.0 }
  0x90   :  { %v95_v23 = vpop.f32.mrf.mxu0 }
  0x91   :  { %v96_v25 = vadd.f32 %v95_v23, %v48_v21 }
  0x93   :  { %v103_v28 = vmax.f32 %v96_v25, 0.0 }
  0x95   :  { %159 = vmatpush.msra.mxu1 %v103_v28  ;;  %260 = vmatpush.msra.mxu3 %v103_v28 }
  0x97   :  { %160 = vmatpush.msra.mxu1 %v102_v29  ;;  %261 = vmatpush.msra.mxu3 %v102_v29 }
  0x99   :  { %161 = vmatpush.msra.mxu1 %v101_v30  ;;  %262 = vmatpush.msra.mxu3 %v101_v30 }
  0x9a   :  { %253 = vmatmul.msk.f32.vlgmr.msra.gmra.mxu1 %vm133_vm2, %v105_v31  ;;  %255 = vmatmul.msk.f32.vlgmr.msra.gmra.mxu3 %vm133_vm2, %v107_v32 }
  0xa2   :  { %254 = vmatmul.msk.f32.gmra.mxu1 %vm133_vm2, %v106_v33  ;;  %256 = vmatmul.msk.f32.gmra.mxu3 %vm133_vm2, %v108_v34 }
 0x117   :  { %v163_v36 = vpop.f32.mrf.mxu1 }
 0x118   :  { %v164_v47 = vadd.f32 %v163_v36, %v116_v46 }
 0x11a   :  { %v175_v50 = vmax.f32 %v164_v47, 0.0 }
 0x11d   :  { %v169_v37 = vpop.f32.mrf.mxu3 }
 0x11e   :  { %v170_v41 = vadd.f32 %v169_v37, %v126_v38 }
 0x11f   :  { %v166_v39 = vpop.f32.mrf.mxu1 }
 0x120   :  { %v167_v44 = vadd.f32 %v166_v39, %v121_v43  ;;  %v177_v48 = vmax.f32 %v170_v41, 0.0 }
 0x122   :  { %v176_v49 = vmax.f32 %v167_v44, 0.0 }
 0x125   :  { %v172_v40 = vpop.f32.mrf.mxu3 }
 0x126   :  { %v173_v42 = vadd.f32 %v172_v40, %v131_v35 }
 0x128   :  { %v178_v45 = vmax.f32 %v173_v42, 0.0 }
 0x12a   :  { %201 = vmatpush.msrb.mxu2 %v178_v45 }
 0x12c   :  { %202 = vmatpush.msrb.mxu2 %v177_v48 }
 0x12e   :  { %203 = vmatpush.msrb.mxu2 %v176_v49 }
 0x130   :  { %204 = vmatpush.msrb.mxu2 %v175_v50 }
 0x131   :  { %257 = vmatmul.msk.f32.vlgmr.msrb.gmra.mxu2 %vm133_vm2, %v179_v51 }
 0x1b4   :  { %v206_v53 = vpop.f32.mrf.mxu2 }
 0x1b5   :  { %v207_v54 = vadd.f32 %v206_v53, %v184_v52 }
 0x1b7   :  { %v209_v55 = vmax.f32 %v207_v54, 0.0 }
 0x1b9   :  { %v211_v56 = vsel %vm210_vm3, %v209_v55, -inf }
 0x1ba   :  { %v212_v57 = vrot.slane %v211_v56, 4 }
 0x1bc   :  { %v213_v58 = vmax.f32 %v211_v56, %v212_v57 }
 0x1be   :  { %v214_v59 = vrot.slane %v213_v58, 2 }
 0x1c0   :  { %v215_v60 = vmax.f32 %v213_v58, %v214_v59 }
 0x1c2   :  { %v216_v61 = vrot.slane %v215_v60, 1 }
 0x1c4   :  { %v217_v62 = vmax.f32 %v215_v60, %v216_v61 }
 0x1c6   :  { %v218_v63 = vsub.f32 %v209_v55, %v217_v62 }
 0x1c8   :  { %v219_v0 = vmul.f32 1.442695, %v218_v63 }
 0x1ca   :  { %267 = vpow2.f32 %v219_v0 }
 0x1d0   :  { %v268_v1 = vpop.eup %267 }
 0x1d1   :  { %v221_v2 = vsel %vm210_vm3, %v268_v1, 0.0 }
 0x1d2   :  { %v222_v3 = vrot.slane %v221_v2, 4 }
 0x1d4   :  { %v223_v4 = vadd.f32 %v222_v3, %v221_v2 }
 0x1d6   :  { %v224_v5 = vrot.slane %v223_v4, 2 }
 0x1d8   :  { %v225_v6 = vadd.f32 %v224_v5, %v223_v4 }
 0x1da   :  { %v226_v7 = vrot.slane %v225_v6, 1 }
 0x1dc   :  { %v227_v8 = vadd.f32 %v226_v7, %v225_v6 }
 0x1de   :  { %269 = vrcp.f32 %v227_v8  ;;  %v239_v12 = vand.u32 2147483648, %v227_v8  ;;  %v237_v14 = vand.u32 2147483647, %v227_v8  ;;  %vm233_vm5 = vweird.f32 %v227_v8 }
 0x1e0   :  { %v240_v16 = vor.u32 1.1754944e-38, %v239_v12  ;;  %vm238_vm7 = vcmp.eq.f32.partialorder %v237_v14, 8.507059e+37 }
 0x1e4   :  { %v270_v9 = vpop.eup %269 }
 0x1e5   :  { %v229_v10 = vmul.f32 %v270_v9, %v227_v8  ;;  %vm234_vm4 = vweird.f32 %v270_v9 }
 0x1e6   :  { %vm235_vm6 = vmor %vm233_vm5, %vm234_vm4 }
 0x1e7   :  { %v230_v11 = vsub.f32 1.0, %v229_v10 }
 0x1e9   :  { %v231_v13 = vmul.f32 %v270_v9, %v230_v11 }
 0x1eb   :  { %v232_v15 = vadd.f32 %v270_v9, %v231_v13 }
 0x1ed   :  { %v236_v17 = vsel %vm235_vm6, %v270_v9, %v232_v15 }
 0x1ee   :  { %v241_v18 = vsel %vm238_vm7, %v240_v16, %v236_v17 }
 0x1ef   :  { %v242_v19 = vmul.f32 %v268_v1, %v241_v18 }
 0x1f1   :  { %243 = vst [vmem:[%s388_s7] sm:$0x3] %v242_v19 }

</bundles_post_ra>
